<compile_context>
chip_gen: v5e
topology: v5e:2x2
jax: 0.10.0
libtpu: 0.0.40
codegen_flags: <defaults>
</compile_context>

<pallas_src>
import jax
import jax.numpy as jnp
from jax import lax
from jax.experimental import pallas as pl
from jax.experimental.pallas import tpu as pltpu

BN_EPS = 1e-5


# --------------------------------------------------------------------------
# Wrapper-side helper: reduce per-tile (sum, sum_sq) partials -> BN scale/shift
# (training-mode batch statistics, biased variance, like nn.BatchNorm2d in
# training mode).  Tiny arrays -> plain JAX, done once per stage.
# --------------------------------------------------------------------------
def _bn_coeffs(stats, gamma, beta, count):
    c = stats.shape[-1]
    s = jnp.sum(stats.reshape(-1, 2, c), axis=0)          # (2, C)
    mean = s[0] / count
    var = s[1] / count - mean * mean                      # biased variance
    # TODO(synk): one-pass E[x^2]-E[x]^2 can cancel for very large N*H*W with
    # non-zero means; switch to centered per-tile partials if tolerance bites.
    scale = gamma.reshape(-1) * lax.rsqrt(var + BN_EPS)
    shift = beta.reshape(-1) - mean * scale
    return scale.reshape(1, c), shift.reshape(1, c)


# --------------------------------------------------------------------------
# Stage 1: conv1 (1x1) + partial BN1 statistics.  Grid (N, row_tiles).
# --------------------------------------------------------------------------
def _conv1_kernel(x_ref, w_ref, y_ref, s_ref):
    _, th, w, c = x_ref.shape
    x = x_ref[0].reshape(th * w, c)                        # bf16 (rows, C)
    y = jnp.dot(x, w_ref[...], preferred_element_type=jnp.float32)
    y_ref[0] = y.reshape(th, w, w_ref.shape[1]).astype(y_ref.dtype)   # bf16 store
    # Statistics from the f32 accumulator (before the bf16 downcast).
    s_ref[0, 0, 0:1, :] = jnp.sum(y, axis=0, keepdims=True)
    s_ref[0, 0, 1:2, :] = jnp.sum(y * y, axis=0, keepdims=True)


# --------------------------------------------------------------------------
# Stage 2: BN1 + ReLU + conv2 (3x3, stride 1, pad 1) + partial BN2 statistics.
# Per-image grid (needs the 1-pixel halo).  bf16 padded scratch, 9 MXU taps.
# --------------------------------------------------------------------------
def _conv2_kernel(y1_ref, sc_ref, sh_ref, w2_ref, y2_ref, s_ref, pad_ref):
    _, h, w, p = y1_ref.shape
    hw = h * w

    act = jnp.maximum(y1_ref[0].astype(jnp.float32) * sc_ref[...] + sh_ref[...],
                      0.0)                                 # (H, W, P) f32

    # Zero only the 1-pixel border (re-zeroed every step: megacore-safe); the
    # interior is fully overwritten with the bf16 activation (single cast).
    zrow = jnp.zeros((1, w + 2, p), jnp.bfloat16)
    zcol = jnp.zeros((h + 2, 1, p), jnp.bfloat16)
    pad_ref[0:1, :, :] = zrow
    pad_ref[h + 1:h + 2, :, :] = zrow
    pad_ref[:, 0:1, :] = zcol
    pad_ref[:, w + 1:w + 2, :] = zcol
    pad_ref[1:h + 1, 1:w + 1, :] = act.astype(jnp.bfloat16)

    w2 = w2_ref[...]                                       # (9, P, P) bf16
    acc = jnp.zeros((hw, p), jnp.float32)
    for t in range(9):                                     # 9 shifted MXU taps
        dy, dx = t // 3, t % 3
        win = pad_ref[dy:dy + h, dx:dx + w, :].reshape(hw, p)   # bf16
        acc = acc + jnp.dot(win, w2[t], preferred_element_type=jnp.float32)

    y2_ref[0] = acc.reshape(h, w, p).astype(y2_ref.dtype)  # bf16 store
    s_ref[0, 0:1, :] = jnp.sum(acc, axis=0, keepdims=True)
    s_ref[0, 1:2, :] = jnp.sum(acc * acc, axis=0, keepdims=True)


# --------------------------------------------------------------------------
# Stage 3: BN2 + ReLU + conv3 (1x1) + partial BN3 statistics. Grid (N, tiles).
# --------------------------------------------------------------------------
def _conv3_kernel(y2_ref, sc_ref, sh_ref, w3_ref, y3_ref, s_ref):
    _, th, w, p = y2_ref.shape
    c = w3_ref.shape[1]
    act = jnp.maximum(y2_ref[0].astype(jnp.float32) * sc_ref[...] + sh_ref[...],
                      0.0)
    act = act.reshape(th * w, p).astype(jnp.bfloat16)
    y = jnp.dot(act, w3_ref[...], preferred_element_type=jnp.float32)
    y3_ref[0] = y.reshape(th, w, c).astype(y3_ref.dtype)   # bf16 store
    s_ref[0, 0, 0:1, :] = jnp.sum(y, axis=0, keepdims=True)
    s_ref[0, 0, 1:2, :] = jnp.sum(y * y, axis=0, keepdims=True)


# --------------------------------------------------------------------------
# Stage 4: BN3 + residual add (f32 x) + ReLU.  Grid (N, row_tiles).
# --------------------------------------------------------------------------
def _bn_add_relu_kernel(y3_ref, sc_ref, sh_ref, x_ref, o_ref):
    out = y3_ref[0].astype(jnp.float32) * sc_ref[...] + sh_ref[...] + x_ref[0]
    o_ref[0] = jnp.maximum(out, 0.0).astype(o_ref.dtype)


# --------------------------------------------------------------------------
# Wrapper
# --------------------------------------------------------------------------
def bottleneck_forward(x_nhwc, w1, g1, b1, w2, g2, b2, w3, g3, b3, *, row_tile=8):
    N, H, W, C = x_nhwc.shape
    P = w1.shape[1]
    assert w3.shape[1] == C, "residual add requires inplanes == planes * 4"
    count = N * H * W                     # elements per channel for batch stats

    # Row tiling for the 1x1 / pointwise stages (multiple-of-8 rows; fall back
    # to the full image if H does not divide evenly).
    TH = row_tile if (row_tile and H % row_tile == 0) else H
    HT = H // TH
    # NOTE: (TH*W) should be a multiple of 8 so the (TH,W,C)->(TH*W,C) reshape
    # stays a view (W=16 here); otherwise pad W or keep a 3-D dot_general.

    f32, bf16 = jnp.float32, jnp.bfloat16
    xb = x_nhwc.astype(bf16)                     # bf16 copy for stage 1 only
    w1b = w1.astype(bf16)                        # (C, P)
    w2b = w2.reshape(9, P, P).astype(bf16)       # (ky*3+kx, Pin, Pout), HWIO
    w3b = w3.astype(bf16)                        # (P, C)

    vmem_cap = 32 * 1024 * 1024                  # headroom on v7x's 64 MiB VMEM
    cp2 = pltpu.CompilerParams(dimension_semantics=("parallel", "parallel"),
                               vmem_limit_bytes=vmem_cap)
    cp1 = pltpu.CompilerParams(dimension_semantics=("parallel",),
                               vmem_limit_bytes=vmem_cap)

    def tile(c):
        return pl.BlockSpec((1, TH, W, c), lambda n, t: (n, t, 0, 0))

    def vec2(c):
        return pl.BlockSpec((1, c), lambda n, t: (0, 0))

    # --- stage 1: conv1 + bn1 partial stats ---------------------------------
    y1, s1 = pl.pallas_call(
        _conv1_kernel,
        grid=(N, HT),
        in_specs=[tile(C), pl.BlockSpec((C, P), lambda n, t: (0, 0))],
        out_specs=(tile(P), pl.BlockSpec((1, 1, 2, P), lambda n, t: (n, t, 0, 0))),
        out_shape=(jax.ShapeDtypeStruct((N, H, W, P), bf16),
                   jax.ShapeDtypeStruct((N, HT, 2, P), f32)),
        compiler_params=cp2,
    )(xb, w1b)
    sc1, sh1 = _bn_coeffs(s1, g1, b1, count)

    # --- stage 2: bn1 + relu + conv2 (3x3) + bn2 partial stats ---------------
    y2, s2 = pl.pallas_call(
        _conv2_kernel,
        grid=(N,),
        in_specs=[pl.BlockSpec((1, H, W, P), lambda n: (n, 0, 0, 0)),
                  pl.BlockSpec((1, P), lambda n: (0, 0)),
                  pl.BlockSpec((1, P), lambda n: (0, 0)),
                  pl.BlockSpec((9, P, P), lambda n: (0, 0, 0))],
        out_specs=(pl.BlockSpec((1, H, W, P), lambda n: (n, 0, 0, 0)),
                   pl.BlockSpec((1, 2, P), lambda n: (n, 0, 0))),
        out_shape=(jax.ShapeDtypeStruct((N, H, W, P), bf16),
                   jax.ShapeDtypeStruct((N, 2, P), f32)),
        scratch_shapes=[pltpu.VMEM((H + 2, W + 2, P), bf16)],
        compiler_params=cp1,
    )(y1, sc1, sh1, w2b)
    sc2, sh2 = _bn_coeffs(s2, g2, b2, count)

    # --- stage 3: bn2 + relu + conv3 (1x1) + bn3 partial stats ---------------
    y3, s3 = pl.pallas_call(
        _conv3_kernel,
        grid=(N, HT),
        in_specs=[tile(P), vec2(P), vec2(P),
                  pl.BlockSpec((P, C), lambda n, t: (0, 0))],
        out_specs=(tile(C), pl.BlockSpec((1, 1, 2, C), lambda n, t: (n, t, 0, 0))),
        out_shape=(jax.ShapeDtypeStruct((N, H, W, C), bf16),
                   jax.ShapeDtypeStruct((N, HT, 2, C), f32)),
        compiler_params=cp2,
    )(y2, sc2, sh2, w3b)
    sc3, sh3 = _bn_coeffs(s3, g3, b3, count)

    # --- stage 4: bn3 + residual + relu --------------------------------------
    out = pl.pallas_call(
        _bn_add_relu_kernel,
        grid=(N, HT),
        in_specs=[tile(C), vec2(C), vec2(C), tile(C)],
        out_specs=tile(C),
        out_shape=jax.ShapeDtypeStruct((N, H, W, C), f32),
        compiler_params=cp2,
    )(y3, sc3, sh3, x_nhwc)

    return out


# --------------------------------------------------------------------------
# Pure-JAX reference.  Mirrors the kernel's numerics: bf16 MXU inputs with f32
# accumulation, BN statistics taken from the f32 conv output, and the stored
# intermediate rounded to bf16 before normalization (so the comparison
# isolates kernel correctness from the intentional bf16-intermediate choice).
# --------------------------------------------------------------------------
def reference_forward(x, w1, g1, b1, w2, g2, b2, w3, g3, b3):
    dn = ('NHWC', 'HWIO', 'NHWC')
    bf16, f32 = jnp.bfloat16, jnp.float32

    def conv(inp, w, same):
        return lax.conv_general_dilated(
            inp.astype(bf16), w.astype(bf16), (1, 1),
            'SAME' if same else 'VALID',
            dimension_numbers=dn, preferred_element_type=f32)

    def bn(y_f32, g, b, relu):
        mean = jnp.mean(y_f32, axis=(0, 1, 2), keepdims=True)
        var = jnp.mean((y_f32 - mean) ** 2, axis=(0, 1, 2), keepdims=True)
        scale = g * lax.rsqrt(var + BN_EPS)
        shift = b - mean * scale
        yq = y_f32.astype(bf16).astype(f32)          # bf16 inter-stage store
        out = yq * scale + shift
        return jnp.maximum(out, 0.0) if relu else out

    out = bn(conv(x, w1[None, None], False), g1, b1, True)
    out = bn(conv(out, w2, True), g2, b2, True)
    out = bn(conv(out, w3[None, None], False), g3, b3, False)
    return jnp.maximum(out + x, 0.0)


if __name__ == "__main__":
    # Small shapes: batch=2, inplanes=16, planes=4 (expansion 4 -> out=16), 16x16.
    N, H, W = 2, 16, 16
    planes = 4
    inplanes = planes * 4          # residual add requires this (downsample=None)
    Cout = planes * 4

    key = jax.random.PRNGKey(0)
    ks = jax.random.split(key, 8)

    # PyTorch input is NCHW; build NHWC directly (deterministic).
    x = jax.random.normal(ks[0], (N, H, W, inplanes), jnp.float32)

    # Conv weights in matmul-friendly layouts:
    #   w1: (Cin, P)          <- torch (P, Cin, 1, 1)
    #   w2: (3, 3, P, P) HWIO <- torch (P, P, 3, 3)
    #   w3: (P, Cout)         <- torch (Cout, P, 1, 1)
    w1 = jax.random.normal(ks[1], (inplanes, planes), jnp.float32) * 0.1
    w2 = jax.random.normal(ks[2], (3, 3, planes, planes), jnp.float32) * 0.1
    w3 = jax.random.normal(ks[3], (planes, Cout), jnp.float32) * 0.1

    # BatchNorm affine params (gamma, beta), per-channel, stored as (1, C).
    g1 = 1.0 + 0.1 * jax.random.normal(ks[4], (1, planes), jnp.float32)
    b1 = 0.1 * jax.random.normal(ks[5], (1, planes), jnp.float32)
    g2 = 1.0 + 0.1 * jax.random.normal(ks[6], (1, planes), jnp.float32)
    b2 = 0.1 * jax.random.normal(ks[7], (1, planes), jnp.float32)
    g3 = jnp.ones((1, Cout), jnp.float32)
    b3 = jnp.zeros((1, Cout), jnp.float32)

    out = bottleneck_forward(x, w1, g1, b1, w2, g2, b2, w3, g3, b3)
    out = jax.block_until_ready(out)

    ref = reference_forward(x, w1, g1, b1, w2, g2, b2, w3, g3, b3)
    ref = jax.block_until_ready(ref)

    assert out.shape == (N, H, W, Cout)
    err = float(jnp.max(jnp.abs(out - ref)))
    assert jnp.allclose(out, ref, rtol=5e-3, atol=5e-3), f"max abs err {err}"

    print("KERNEL_OK")
</pallas_src>

<mosaic_0001>
module attributes {stable_mosaic.version = 11 : i64} {
  func.func @_conv1_kernel(%arg0: i32, %arg1: i32, %arg2: memref<1x8x16x16xbf16, #tpu.memory_space<vmem>>, %arg3: memref<16x4xbf16, #tpu.memory_space<vmem>>, %arg4: memref<1x8x16x4xbf16, #tpu.memory_space<vmem>>, %arg5: memref<1x1x2x4xf32, #tpu.memory_space<vmem>>) attributes {dimension_semantics = [#tpu.dimension_semantics<parallel>, #tpu.dimension_semantics<parallel>], iteration_bounds = array<i64: 2, 2>, scalar_prefetch = 0 : i64, scratch_operands = 0 : i64, tpu.core_type = #tpu.core_type<tc>, window_params = [{transform_indices = @transform_0, window_bounds = array<i64: 1, 8, 16, 16>}, {pipeline_mode = #tpu.pipeline_mode<synchronous>, transform_indices = @transform_1, window_bounds = array<i64: 16, 4>}, {transform_indices = @transform_2, window_bounds = array<i64: 1, 8, 16, 4>}, {transform_indices = @transform_3, window_bounds = array<i64: 1, 1, 2, 4>}]} {
    %c0 = arith.constant 0 : index
    %c0_0 = arith.constant 0 : index
    %c0_1 = arith.constant 0 : index
    %c0_2 = arith.constant 0 : index
    %0 = vector.load %arg2[%c0, %c0_0, %c0_1, %c0_2] : memref<1x8x16x16xbf16, #tpu.memory_space<vmem>>, vector<1x8x16x16xbf16>
    %1 = vector.shape_cast %0 : vector<1x8x16x16xbf16> to vector<8x16x16xbf16>
    %2 = vector.shape_cast %1 : vector<8x16x16xbf16> to vector<128x16xbf16>
    %c0_3 = arith.constant 0 : index
    %c0_4 = arith.constant 0 : index
    %3 = vector.load %arg3[%c0_3, %c0_4] : memref<16x4xbf16, #tpu.memory_space<vmem>>, vector<16x4xbf16>
    %cst = arith.constant dense<0.000000e+00> : vector<128x4xf32>
    %4 = tpu.matmul %2, %3, %cst {dimension_numbers = #tpu.dot_dimension_numbers<[1], [0], [0], [1], [0, 0, 1, 1], [], []>} : vector<128x16xbf16>, vector<16x4xbf16>, vector<128x4xf32> -> vector<128x4xf32>
    %5 = vector.shape_cast %4 : vector<128x4xf32> to vector<8x16x4xf32>
    %6 = arith.truncf %5 : vector<8x16x4xf32> to vector<8x16x4xbf16>
    %c0_5 = arith.constant 0 : index
    %c0_6 = arith.constant 0 : index
    %c0_7 = arith.constant 0 : index
    %c0_8 = arith.constant 0 : index
    %7 = vector.load %arg4[%c0_5, %c0_6, %c0_7, %c0_8] : memref<1x8x16x4xbf16, #tpu.memory_space<vmem>>, vector<1x8x16x4xbf16>
    %8 = vector.shape_cast %7 : vector<1x8x16x4xbf16> to vector<8x16x4xbf16>
    %9 = vector.shape_cast %6 : vector<8x16x4xbf16> to vector<1x8x16x4xbf16>
    tpu.vector_store %arg4[%c0_5, %c0_6, %c0_7, %c0_8], %9 {strides = array<i32>} : memref<1x8x16x4xbf16, #tpu.memory_space<vmem>>, vector<1x8x16x4xbf16>,
    %cst_9 = arith.constant dense<0.000000e+00> : vector<4xf32>
    %10 = vector.multi_reduction <add>, %4, %cst_9 [0] : vector<128x4xf32> to vector<4xf32>
    %11 = vector.shape_cast %10 : vector<4xf32> to vector<1x4xf32>
    %c0_10 = arith.constant 0 : index
    %c0_11 = arith.constant 0 : index
    %c0_12 = arith.constant 0 : index
    %c0_13 = arith.constant 0 : index
    %12 = vector.load %arg5[%c0_10, %c0_11, %c0_12, %c0_13] : memref<1x1x2x4xf32, #tpu.memory_space<vmem>>, vector<1x1x1x4xf32>
    %13 = vector.shape_cast %12 : vector<1x1x1x4xf32> to vector<1x4xf32>
    %14 = vector.shape_cast %11 : vector<1x4xf32> to vector<1x1x1x4xf32>
    tpu.vector_store %arg5[%c0_10, %c0_11, %c0_12, %c0_13], %14 {strides = array<i32>} : memref<1x1x2x4xf32, #tpu.memory_space<vmem>>, vector<1x1x1x4xf32>,
    %15 = arith.mulf %4, %4 : vector<128x4xf32>
    %cst_14 = arith.constant dense<0.000000e+00> : vector<4xf32>
    %16 = vector.multi_reduction <add>, %15, %cst_14 [0] : vector<128x4xf32> to vector<4xf32>
    %17 = vector.shape_cast %16 : vector<4xf32> to vector<1x4xf32>
    %c0_15 = arith.constant 0 : index
    %c0_16 = arith.constant 0 : index
    %c1 = arith.constant 1 : index
    %c0_17 = arith.constant 0 : index
    %18 = vector.load %arg5[%c0_15, %c0_16, %c1, %c0_17] : memref<1x1x2x4xf32, #tpu.memory_space<vmem>>, vector<1x1x1x4xf32>
    %19 = vector.shape_cast %18 : vector<1x1x1x4xf32> to vector<1x4xf32>
    %20 = vector.shape_cast %17 : vector<1x4xf32> to vector<1x1x1x4xf32>
    tpu.vector_store %arg5[%c0_15, %c0_16, %c1, %c0_17], %20 {strides = array<i32>} : memref<1x1x2x4xf32, #tpu.memory_space<vmem>>, vector<1x1x1x4xf32>,
    return
  }
  func.func @transform_0(%arg0: i32, %arg1: i32) -> (i32, i32, i32, i32) {
    %c0_i32 = arith.constant 0 : i32
    %c0_i32_0 = arith.constant 0 : i32
    %c0_i32_1 = arith.constant 0 : i32
    return %arg0, %arg1, %c0_i32, %c0_i32_0 : i32, i32, i32, i32
  }
  func.func @transform_1(%arg0: i32, %arg1: i32) -> (i32, i32) {
    %c0_i32 = arith.constant 0 : i32
    %c0_i32_0 = arith.constant 0 : i32
    %c0_i32_1 = arith.constant 0 : i32
    return %c0_i32, %c0_i32_0 : i32, i32
  }
  func.func @transform_2(%arg0: i32, %arg1: i32) -> (i32, i32, i32, i32) {
    %c0_i32 = arith.constant 0 : i32
    %c0_i32_0 = arith.constant 0 : i32
    %c0_i32_1 = arith.constant 0 : i32
    return %arg0, %arg1, %c0_i32, %c0_i32_0 : i32, i32, i32, i32
  }
  func.func @transform_3(%arg0: i32, %arg1: i32) -> (i32, i32, i32, i32) {
    %c0_i32 = arith.constant 0 : i32
    %c0_i32_0 = arith.constant 0 : i32
    %c0_i32_1 = arith.constant 0 : i32
    return %arg0, %arg1, %c0_i32, %c0_i32_0 : i32, i32, i32, i32
  }
}

</mosaic_0001>

<bundles_post_ra>
// kernel: tpu_custom_call.1
= control target key start
LH: loop header
LB: loop body
LE: loop exit
PB: predicated region body
PF: predicated region fallthrough
CT: control target
= control target key end

     0   :  { %9 = vsyncpa [#allocation3], 0  ;;  %s1234_s0 = inlined_call_operand.hbm [shape: bf16[2,16,16,16], index: 0, kind: input, shape index: {}]   ;;  %s1235_s1 = inlined_call_operand.vmem [shape: bf16[16,4], index: 1, kind: input, shape index: {}]   ;;  %s1236_s2 = inlined_call_operand.vmem [shape: bf16[2,16,16,4], index: 2, kind: output, shape index: {0}]   ;;  %s1237_s3 = inlined_call_operand.hbm [shape: f32[2,2,2,4], index: 3, kind: output, shape index: {1}]  }
   0x1   :  { %11 = vsyncpa [#allocation3 + $0x1], 0 }
   0x2   :  { %12 = vsyncpa [#allocation4], 0 }
   0x3   :  { %14 = vsyncpa [#allocation4 + $0x1], 0  ;;  %s973_s12 = smov 0   ;;  %s975_s13 = smov 0  }
   0x4   :  { %s977_s14 = smov 0   ;;  %s979_s15 = smov 0  }
   0x5   :  { %s981_s16 = smov 0   ;;  %s983_s17 = smov 0  }
   0x6   :  { %s985_s18 = smov 0   ;;  %s987_s19 = smov 0  }
   0x7 LB: > { %s663_s20 = sadd.s32 4294967295, %s949_s19   ;;  %s664_s21 = sadd.s32 4294967294, %s949_s19   ;;  %s949_s19 = sphi %s987_s19, %s20_s19   ;;  %s945_s18 = sphi %s985_s18, %s1256_s18   ;;  %s941_s17 = sphi %s983_s17, %s1255_s17   ;;  %s937_s16 = sphi %s981_s16, %s1254_s16   ;;  %s933_s15 = sphi %s979_s15, %s1253_s15   ;;  %s929_s14 = sphi %s977_s14, %s1252_s14   ;;  %s925_s13 = sphi %s975_s13, %s1251_s13   ;;  %s921_s12 = sphi %s973_s12, %s1250_s12  }
   0x8   : > { %s29_s22 = sadd.s32 1, %s941_s17  ;;  %s32_s23 = sadd.s32 1, %s945_s18 }
   0x9   : > { %p30_p0 = scmp.ge.s32.totalorder %s29_s22, 2  ;;  %s41_s24 = sadd.s32 1, %s929_s14 }
   0xa   : > { %p48_p1 = scmp.ne.s32.totalorder %s929_s14, %s925_s13  ;;  %p49_p2 = scmp.eq.s32.totalorder %s949_s19, 0 }
   0xb   : > { %s1258_s22 = smov (%p30_p0, %s29_s22), 0  ;;  %s1260_s23 = smov (!%p30_p0, %s32_s23), %s945_s18 }
   0xc   : > { %1240 = sst [smem:[#allocation8_spill]] %s1258_s22  ;;  %s37_s25 = ssub.s32 %s941_s17, %s1258_s22 }
   0xd   : > { %p1026_p3 = por %p49_p2, %p48_p1  ;;  %p34_p4 = scmp.ge.s32.totalorder %s1260_s23, 2 }
   0xe   : > { %p54_p5 = scmp.ne.s32.totalorder %s925_s13, %s921_s12  ;;  %p55_p6 = scmp.eq.s32.totalorder %s663_s20, 0 }
   0xf   : > { %p129_p7 = scmp.eq.s32.totalorder %s663_s20, 3  ;;  %s1262_s23 = smov (%p34_p4, %s1260_s23), 0 }
  0x10   : > { %1242 = sst [smem:[#allocation9_spill]] %s1262_s23  ;;  %p1034_p8 = por %p55_p6, %p54_p5 }
  0x11   : > { %p1038_p9 = por %p129_p7, %p48_p1  ;;  %s36_s29 = ssub.s32 %s945_s18, %s1262_s23 }
  0x12   : > { %p135_p10 = scmp.eq.s32.totalorder %s664_s21, 3  ;;  %s38_s30 = sor.u32 %s37_s25, %s36_s29 }
  0x13   : > { %p39_p11 = scmp.eq.s32.totalorder %s38_s30, 0  ;;  %p753_p13 = scmp.lt.s32.totalorder %s949_s19, 4 }
  0x14   : > { %p1044_p12 = por %p135_p10, %p54_p5  ;;  %s158_s5 = sand.u32 1, %s929_s14  }
  0x15   : > { %s1051_s6 = scalar_select %p39_p11, %s929_s14, %s41_s24  }
  0x16   : > { %s667_s7 = sshll.u32 %s158_s5, 6  ;;  %s728_s8 = sshll.u32 %s941_s17, 4 }
  0x17   : > { %1246 = sst [smem:[#allocation10_spill]] %s1051_s6  ;;  %s670_s9 = sshll.u32 %s945_s18, 5 }
  0x18   : > { %s162_s10 = scalar_lea.vmem [#allocation2], %s667_s7  ;;  %s168_s20 = sadd.s32 %s728_s8, %s670_s9 }
  0x19   : > { %s173_s11 = sshll.u32 %s162_s10, 4  ;;  %s671_s21 = sshll.u32 %s168_s20, 2  ;;  %s174_s11 = int_to_ptr.vmem [resolvable:$true] %s173_s11 }
  0x1a   : > { %p746_p0 = pnand %p753_p13, %p1026_p3  ;;  %s170_s30 = scalar_lea.hbm %s1234_s0, %s671_s21 }
  0x1b   : > { %s171_s23 = sshll.u32 %s170_s30, 4  ;;  %s159_s24 = scalar_lea.sflag [#allocation3], %s158_s5  ;;  %s172_s23 = int_to_ptr.hbm [resolvable:$true] %s171_s23 }
  0x1c   : > { %s951_s22 = smov 64   ;;  %s952_s6 = smov 4  }
  0x1d   : > { %748 = dma.hbm_to_vmem [thread:$0]  (!%p746_p0), %s172_s23, 1024, %s174_s11, %s159_s24, %s951_s22, %s951_s22, %s952_s6  }
  0x1e   : > { %p672_p1 = scmp.ge.s32.totalorder %s949_s19, 1  ;;  %p181_p2 = scmp.lt.s32.totalorder %s949_s19, 5 }
  0x20   : > { %p182_p4 = pnand %p672_p1, %p181_p2 }
  0x21   : > { %s1063_s7 = sand.u32 (!%p182_p4), 1, %s925_s13  }
  0x22   : > { %185 = sbr.rel (%p182_p4) target bundleno = 238 (0xee), region = 28  ;;  %s673_s26 = sshll.u32 (!%p182_p4), %s1063_s7, 6 }
  0x23   : > { %s188_s8 = scalar_lea.sflag (!%p182_p4), [#allocation3], %s1063_s7  ;;  %s191_s9 = scalar_lea.vmem (!%p182_p4), [#allocation2], %s673_s26 }
  0x27   : > { %912 = dma.done.wait (%p1034_p8), %s188_s8, 1024  }
  0x28   : > { %914 = vsyncadd (%p1034_p8), %s188_s8, 4294966272  ;;  %v737_v0 = vld [vmem:[%s1235_s1] sm:$0xff]  ;;  %v731_v2 = vld [vmem:[%s191_s9 + $0x10] sm:$0xff]  ;;  %vm302_vm0 = vcmask 130048   ;;  %s675_s23 = sshll.u32 %s933_s15, 3  ;;  %p227_p3 = scmp.lt.s32.totalorder %s937_s16, 1 }
  0x29   : > { %v729_v1 = vld [vmem:[%s191_s9] sm:$0xff]  ;;  %334 = vmatpush.bf16.msra.mxu0 %v737_v0  ;;  %738 = vmatpush.bf16.msra.mxu1 %v737_v0  ;;  %v735_v4 = vld [vmem:[%s191_s9 + $0x30] sm:$0xff]  ;;  %v730_v5 = vld [vmem:[%s191_s9 + $0x8] sm:$0xff]  ;;  %p229_p5 = scmp.lt.s32.totalorder %s675_s23, 15  ;;  %vm392_vm1 = vcmask 27648   ;;  %vm409_vm2 = vcmask 31744  }
  0x2a   : > { %v733_v3 = vld [vmem:[%s191_s9 + $0x20] sm:$0xff]  ;;  %739 = vmatpush.bf16.msra.mxu2 %v737_v0  ;;  %740 = vmatpush.bf16.msra.mxu3 %v737_v0  ;;  %v732_v6 = vld [vmem:[%s191_s9 + $0x18] sm:$0xff]  ;;  %v734_v7 = vld [vmem:[%s191_s9 + $0x28] sm:$0xff]  ;;  %s228_s27 = scalar_select %p227_p3, %s937_s16, 1  ;;  %vm447_vm3 = vcmask 24576  }
  0x2b   : > { %v736_v8 = vld [vmem:[%s191_s9 + $0x38] sm:$0xff]  ;;  %s1264_s23 = smov (!%p229_p5, %s675_s23), 15  ;;  %s724_s30 = sshll.u32 %s937_s16, 1 }
  0x2c   : > { %715 = vmatmul.msk.bf16.vlgmr.msra.gmra.mxu0 %vm302_vm0, %v729_v1  ;;  %717 = vmatmul.msk.bf16.vlgmr.msra.gmra.mxu1 %vm302_vm0, %v731_v2  ;;  %s676_s6 = sshll.u32 %s1264_s23, 1  ;;  %s677_s10 = sshll.u32 %s228_s27, 5 }
  0x2d   : > { %719 = vmatmul.msk.bf16.vlgmr.msra.gmra.mxu2 %vm302_vm0, %v733_v3  ;;  %721 = vmatmul.msk.bf16.vlgmr.msra.gmra.mxu3 %vm302_vm0, %v735_v4  ;;  %s233_s11 = sadd.s32 %s677_s10, %s676_s6  ;;  %s528_s24 = sadd.s32 %s933_s15, %s724_s30 }
  0x2e   : > { %s678_s20 = sshll.u32 %s233_s11, 2  ;;  %s674_s26 = sshll.u32 %s1063_s7, 1 }
  0x2f   : > { %s1088_s29 = scalar_lea.vmem %s1236_s2, %s678_s20  ;;  %s725_s8 = sshll.u32 %s528_s24, 1 }
  0x30   : > { %s530_s16 = scalar_lea.hbm %s1237_s3, %s725_s8  ;;  %s224_s22 = scalar_lea.vmem [#allocation5], %s674_s26 }
  0x31   : > { %s532_s23 = sshll.u32 %s224_s22, 4  ;;  %s534_s15 = sshll.u32 %s530_s16, 4  ;;  %s533_s23 = int_to_ptr.vmem [resolvable:$true] %s532_s23  ;;  %s535_s15 = int_to_ptr.hbm [resolvable:$true] %s534_s15 }
  0x32   : > { %s514_s27 = scalar_lea.sflag [#allocation4], %s1063_s7  ;;  %s865_s6 = sshra.s32 %s535_s15, 4  ;;  %s866_s6 = int_to_ptr.hbm [resolvable:$true] %s865_s6 }
  0x33   : > { %s867_s10 = scalar_lea.hbm %s866_s6, 2  ;;  %s871_s21 = scalar_lea.hbm %s1237_s3, 8 }
  0x34   : > { %p868_p6 = scmp.ne.s32.totalorder %s866_s6, %s867_s10  ;;  %p872_p10 = scmp.lt.s32.totalorder %s866_s6, %s1237_s3 }
  0x35   : > { %p873_p11 = scmp.lt.s32.totalorder %s871_s21, %s867_s10 }
  0x36   : > { %p869_p7 = pnand %p868_p6, %p1038_p9 }
  0x37   : > { %p874_p13 = por %p873_p11, %p872_p10 }
  0x38   : > { %p870_p8 = pneg %p869_p7 }
  0x3a   : > { %p875_p0 = pnand %p874_p13, %p870_p8 }
  0x3c   : > { %716 = vmatmul.msk.bf16.gmra.mxu0 %vm302_vm0, %v730_v5  ;;  %718 = vmatmul.msk.bf16.gmra.mxu1 %vm302_vm0, %v732_v6 }
  0x3d   : > { %720 = vmatmul.msk.bf16.gmra.mxu2 %vm302_vm0, %v734_v7  ;;  %722 = vmatmul.msk.bf16.gmra.mxu3 %vm302_vm0, %v736_v8 }
  0xa9   : > { %v336_v9 = vpop.f32.mrf.mxu0  ;;  %v346_v10 = vpop.f32.mrf.mxu1 }
  0xaa   : > { %v376_v11 = vpack.c.bf16 %v336_v9, %v336_v9  ;;  %v380_v12 = vpack.c.bf16 %v346_v10, %v346_v10  ;;  %v449_v30 = vmul.f32 %v336_v9, %v336_v9  ;;  %v410_v33 = vsel %vm409_vm2, %v336_v9, 0.0 }
  0xab   : > { %v453_v38 = vmul.f32 %v346_v10, %v346_v10  ;;  %v417_v54 = vsel %vm409_vm2, %v346_v10, 0.0 }
  0xac   : > { %393 = vst.msk [vmem:[%s1088_s29] sm:$0xf] %vm392_vm1, %v376_v11  ;;  %v465_v37 = vsel %vm409_vm2, %v449_v30, 0.0 }
  0xad   : > { %397 = vst.msk [vmem:[%s1088_s29 + $0x10] sm:$0xf] %vm392_vm1, %v380_v12  ;;  %v472_v59 = vsel %vm409_vm2, %v453_v38, 0.0 }
  0xb0   : > { %v1094_v13 = vpop.f32.mrf.mxu2  ;;  %v1096_v14 = vpop.f32.mrf.mxu3 }
  0xb1   : > { %v338_v15 = vpop.f32.mrf.mxu0  ;;  %v348_v16 = vpop.f32.mrf.mxu1  ;;  %v384_v17 = vpack.c.bf16 %v1094_v13, %v1094_v13  ;;  %v388_v20 = vpack.c.bf16 %v1096_v14, %v1096_v14  ;;  %v457_v8 = vmul.f32 %v1094_v13, %v1094_v13 }
  0xb2   : > { %v377_v18 = vpack.c.bf16 %v338_v15, %v338_v15  ;;  %v381_v19 = vpack.c.bf16 %v348_v16, %v348_v16  ;;  %v450_v26 = vmul.f32 %v338_v15, %v338_v15  ;;  %v411_v31 = vsel %vm409_vm2, %v338_v15, 0.0 }
  0xb3   : > { %401 = vst.msk [vmem:[%s1088_s29 + $0x20] sm:$0xf] %vm392_vm1, %v384_v17  ;;  %v412_v36 = vadd.f32 %v411_v31, %v410_v33  ;;  %v454_v55 = vmul.f32 %v348_v16, %v348_v16  ;;  %v419_v60 = vsel %vm409_vm2, %v348_v16, 0.0  ;;  %v425_v16 = vsel %vm409_vm2, %v1094_v13, 0.0 }
  0xb4   : > { %394 = vst.msk [vmem:[%s1088_s29 + $0x4] sm:$0xf] %vm392_vm1, %v377_v18  ;;  %v466_v34 = vsel %vm409_vm2, %v450_v26, 0.0 }
  0xb5   : > { %398 = vst.msk [vmem:[%s1088_s29 + $0x14] sm:$0xf] %vm392_vm1, %v381_v19  ;;  %v467_v42 = vadd.f32 %v466_v34, %v465_v37  ;;  %v474_v0 = vsel %vm409_vm2, %v454_v55, 0.0 }
  0xb6   : > { %405 = vst.msk [vmem:[%s1088_s29 + $0x30] sm:$0xf] %vm392_vm1, %v388_v20 }
  0xb8   : > { %v1110_v21 = vpop.f32.mrf.mxu2  ;;  %v1112_v22 = vpop.f32.mrf.mxu3 }
  0xb9   : > { %v341_v23 = vpop.f32.mrf.mxu0  ;;  %v351_v24 = vpop.f32.mrf.mxu1  ;;  %v385_v25 = vpack.c.bf16 %v1110_v21, %v1110_v21  ;;  %v389_v29 = vpack.c.bf16 %v1112_v22, %v1112_v22  ;;  %v458_v17 = vmul.f32 %v1110_v21, %v1110_v21  ;;  %v462_v37 = vmul.f32 %v1112_v22, %v1112_v22 }
  0xba   : > { %v378_v27 = vpack.c.bf16 %v341_v23, %v341_v23  ;;  %v382_v28 = vpack.c.bf16 %v351_v24, %v351_v24  ;;  %v451_v32 = vmul.f32 %v341_v23, %v341_v23  ;;  %v413_v35 = vsel %vm409_vm2, %v341_v23, 0.0 }
  0xbb   : > { %402 = vst.msk [vmem:[%s1088_s29 + $0x24] sm:$0xf] %vm392_vm1, %v385_v25  ;;  %v414_v43 = vadd.f32 %v413_v35, %v412_v36  ;;  %v455_v61 = vmul.f32 %v351_v24, %v351_v24  ;;  %v421_v1 = vsel %vm409_vm2, %v351_v24, 0.0  ;;  %v480_v23 = vsel %vm409_vm2, %v457_v8, 0.0 }
  0xbc   : > { %395 = vst.msk [vmem:[%s1088_s29 + $0x8] sm:$0xf] %vm392_vm1, %v378_v27  ;;  %v468_v39 = vsel %vm409_vm2, %v451_v32, 0.0  ;;  %v427_v24 = vsel %vm409_vm2, %v1110_v21, 0.0  ;;  %v461_v32 = vmul.f32 %v1096_v14, %v1096_v14  ;;  %v433_v21 = vsel %vm409_vm2, %v1096_v14, 0.0 }
  0xbd   : > { %399 = vst.msk [vmem:[%s1088_s29 + $0x18] sm:$0xf] %vm392_vm1, %v382_v28  ;;  %v469_v52 = vadd.f32 %v468_v39, %v467_v42  ;;  %v476_v9 = vsel %vm409_vm2, %v455_v61, 0.0  ;;  %v482_v28 = vsel %vm409_vm2, %v458_v17, 0.0  ;;  %v490_v14 = vsel %vm409_vm2, %v462_v37, 0.0 }
  0xbe   : > { %406 = vst.msk [vmem:[%s1088_s29 + $0x34] sm:$0xf] %vm392_vm1, %v389_v29  ;;  %v488_v42 = vsel %vm409_vm2, %v461_v32, 0.0 }
  0xc0   : > { %v361_v40 = vpop.f32.mrf.mxu2  ;;  %v1132_v41 = vpop.f32.mrf.mxu3 }
  0xc1   : > { %v343_v44 = vpop.f32.mrf.mxu0  ;;  %v353_v45 = vpop.f32.mrf.mxu1  ;;  %v386_v46 = vpack.c.bf16 %v361_v40, %v361_v40  ;;  %v390_v47 = vpack.c.bf16 %v1132_v41, %v1132_v41  ;;  %v459_v25 = vmul.f32 %v361_v40, %v361_v40  ;;  %v429_v13 = vsel %vm409_vm2, %v361_v40, 0.0 }
  0xc2   : > { %v379_v48 = vpack.c.bf16 %v343_v44, %v343_v44  ;;  %v415_v49 = vsel %vm409_vm2, %v343_v44, 0.0  ;;  %v452_v50 = vmul.f32 %v343_v44, %v343_v44  ;;  %v383_v51 = vpack.c.bf16 %v353_v45, %v353_v45 }
  0xc3   : > { %v416_v53 = vadd.f32 %v415_v49, %v414_v43  ;;  %403 = vst.msk [vmem:[%s1088_s29 + $0x28] sm:$0xf] %vm392_vm1, %v386_v46  ;;  %v456_v2 = vmul.f32 %v353_v45, %v353_v45  ;;  %v423_v10 = vsel %vm409_vm2, %v353_v45, 0.0  ;;  %v484_v33 = vsel %vm409_vm2, %v459_v25, 0.0 }
  0xc4   : > { %396 = vst.msk [vmem:[%s1088_s29 + $0xc] sm:$0xf] %vm392_vm1, %v379_v48  ;;  %v470_v56 = vsel %vm409_vm2, %v452_v50, 0.0  ;;  %v435_v43 = vsel %vm409_vm2, %v1112_v22, 0.0  ;;  %v463_v44 = vmul.f32 %v1132_v41, %v1132_v41 }
  0xc5   : > { %v418_v57 = vadd.f32 %v417_v54, %v416_v53  ;;  %v471_v58 = vadd.f32 %v470_v56, %v469_v52  ;;  %400 = vst.msk [vmem:[%s1088_s29 + $0x1c] sm:$0xf] %vm392_vm1, %v383_v51  ;;  %v478_v18 = vsel %vm409_vm2, %v456_v2, 0.0 }
  0xc6   : > { %407 = vst.msk [vmem:[%s1088_s29 + $0x38] sm:$0xf] %vm392_vm1, %v390_v47  ;;  %v437_v47 = vsel %vm409_vm2, %v1132_v41, 0.0  ;;  %v492_v51 = vsel %vm409_vm2, %v463_v44, 0.0 }
  0xc7   : > { %v473_v62 = vadd.f32 %v472_v59, %v471_v58  ;;  %v420_v63 = vadd.f32 %v419_v60, %v418_v57 }
  0xc8   : > { %v363_v3 = vpop.f32.mrf.mxu2  ;;  %v373_v4 = vpop.f32.mrf.mxu3 }
  0xc9   : > { %v422_v5 = vadd.f32 %v421_v1, %v420_v63  ;;  %v475_v6 = vadd.f32 %v474_v0, %v473_v62  ;;  %v387_v7 = vpack.c.bf16 %v363_v3, %v363_v3  ;;  %v391_v11 = vpack.c.bf16 %v373_v4, %v373_v4 }
  0xca   : > { %v460_v29 = vmul.f32 %v363_v3, %v363_v3  ;;  %v431_v34 = vsel %vm409_vm2, %v363_v3, 0.0  ;;  %v464_v48 = vmul.f32 %v373_v4, %v373_v4  ;;  %v439_v52 = vsel %vm409_vm2, %v373_v4, 0.0 }
  0xcb   : > { %v424_v12 = vadd.f32 %v423_v10, %v422_v5  ;;  %v477_v15 = vadd.f32 %v476_v9, %v475_v6  ;;  %404 = vst.msk [vmem:[%s1088_s29 + $0x2c] sm:$0xf] %vm392_vm1, %v387_v7 }
  0xcc   : > { %408 = vst.msk [vmem:[%s1088_s29 + $0x3c] sm:$0xf] %vm392_vm1, %v391_v11  ;;  %v486_v38 = vsel %vm409_vm2, %v460_v29, 0.0  ;;  %v494_v54 = vsel %vm409_vm2, %v464_v48, 0.0 }
  0xcd   : > { %v426_v19 = vadd.f32 %v425_v16, %v424_v12  ;;  %v479_v20 = vadd.f32 %v478_v18, %v477_v15 }
  0xcf   : > { %v481_v26 = vadd.f32 %v480_v23, %v479_v20  ;;  %v428_v27 = vadd.f32 %v427_v24, %v426_v19 }
  0xd1   : > { %v430_v30 = vadd.f32 %v429_v13, %v428_v27  ;;  %v483_v31 = vadd.f32 %v482_v28, %v481_v26 }
  0xd3   : > { %v485_v35 = vadd.f32 %v484_v33, %v483_v31  ;;  %v432_v36 = vadd.f32 %v431_v34, %v430_v30 }
  0xd5   : > { %v434_v39 = vadd.f32 %v433_v21, %v432_v36  ;;  %v487_v40 = vadd.f32 %v486_v38, %v485_v35 }
  0xd7   : > { %v489_v45 = vadd.f32 %v488_v42, %v487_v40  ;;  %v436_v46 = vadd.f32 %v435_v43, %v434_v39 }
  0xd9   : > { %v438_v49 = vadd.f32 %v437_v47, %v436_v46  ;;  %v491_v50 = vadd.f32 %v490_v14, %v489_v45 }
  0xdb   : > { %v493_v22 = vadd.f32 %v492_v51, %v491_v50  ;;  %v440_v53 = vadd.f32 %v439_v52, %v438_v49 }
  0xdd   : > { %v441_v55 = vrot.slane %v440_v53, 4  ;;  %v495_v56 = vadd.f32 %v494_v54, %v493_v22 }
  0xdf   : > { %v442_v57 = vadd.f32 %v441_v55, %v440_v53  ;;  %v496_v58 = vrot.slane %v495_v56, 4 }
  0xe1   : > { %v443_v41 = vrot.slane %v442_v57, 2  ;;  %v497_v59 = vadd.f32 %v496_v58, %v495_v56 }
  0xe3   : > { %v444_v60 = vadd.f32 %v443_v41, %v442_v57  ;;  %v498_v61 = vrot.slane %v497_v59, 2 }
  0xe5   : > { %v445_v62 = vrot.slane %v444_v60, 1  ;;  %v499_v63 = vadd.f32 %v498_v61, %v497_v59 }
  0xe7   : > { %v446_v0 = vadd.f32 %v445_v62, %v444_v60  ;;  %v500_v1 = vrot.slane %v499_v63, 1 }
  0xe9   : > { %v501_v2 = vadd.f32 %v500_v1, %v499_v63  ;;  %448 = vst.msk [vmem:[%s224_s22] sm:$0x1] %vm447_vm3, %v446_v0 }
  0xeb   : > { %502 = vst.msk [vmem:[%s224_s22 + $0x1] sm:$0x1] %vm447_vm3, %v501_v2 }
  0xec   : > { %878 = shalt.err (!%p875_p0)
}
  0xed   : > { %743 = dma.vmem_to_hbm [thread:$0]  (%p1038_p9), %s533_s23, 32, %s535_s15, %s514_s27  }
  0xee PF: > { %p754_p1 = scmp.ge.s32.totalorder %s949_s19, 2  ;;  %s559_s7 = sand.u32 1, %s921_s12  }
  0xef   : > { %s560_s30 = scalar_lea.sflag [#allocation4], %s559_s7 }
  0xf0   : > { %p750_p2 = pnand %p754_p1, %p1044_p12 }
  0xf2   : > { %p751_p4 = pneg %p750_p2 }
  0xf4   : > { %916 = dma.done.wait (%p751_p4), %s560_s30, 32  }
  0xf5   : > { %918 = vsyncadd (%p751_p4), %s560_s30, 4294967264  ;;  %s20_s19 = sadd.s32 1, %s949_s19   ;;  %s1247_s24 = sld [smem:[#allocation10_spill]] }
  0xf6   : > { %p17_p3 = scmp.ge.s32.totalorder %s20_s19, 6   ;;  %s1248_s28 = sld [smem:[#allocation8_spill]] }
  0xf7   : > { %s1249_s26 = sld [smem:[#allocation9_spill]]  ;;  %s1250_s12 = smov %s925_s13 }
  0xf8   : > { %s1251_s13 = smov %s929_s14  ;;  %s1253_s15 = smov %s941_s17 }
  0xf9   : > { %s1254_s16 = smov %s945_s18  ;;  %19 = sbr.rel (!%p17_p3) target bundleno = 7 (0x7), region = 85 }
  0xfb   : > { %s1252_s14 = smov %s1247_s24 }
  0xfc   : > { %s1255_s17 = smov %s1248_s28 }
  0xfd   : > { %s1256_s18 = smov %s1249_s26 }
  0xfe   :  { %566 = vsyncpa [#allocation3], 1 }
  0xff   :  { %568 = vsyncpa [#allocation3 + $0x1], 1 }
 0x100   :  { %569 = vsyncpa [#allocation4], 1 }
 0x101   :  { %571 = vsyncpa [#allocation4 + $0x1], 1 }

</bundles_post_ra>
